<compile_context>
chip_gen: v6e
topology: v6e:2x2x1
jax: 0.10.0
libtpu: 0.0.40
codegen_flags: <defaults>
</compile_context>

<pallas_src>
import math

import jax
import jax.numpy as jnp
from jax.experimental import pallas as pl
from jax.experimental.pallas import tpu as pltpu


def mlp_kernel(x_ref, w1_ref, b1_ref, w2_ref, b2_ref, w3_ref, b3_ref, o_ref):
    # Feature-major: x_ref is [obs, TM] (batch on lanes); weights are torch
    # storage layout [out, in] in bf16; biases [out, 1] f32.
    x = x_ref[...].astype(jnp.bfloat16)
    # fc1 + ReLU (bf16 MXU inputs, f32 accumulate, f32 elementwise)
    h1 = jnp.dot(w1_ref[...], x, preferred_element_type=jnp.float32)
    h1 = jnp.maximum(h1 + b1_ref[...], 0.0)
    # fc2 + ReLU
    h2 = jnp.dot(w2_ref[...], h1.astype(jnp.bfloat16),
                 preferred_element_type=jnp.float32)
    h2 = jnp.maximum(h2 + b2_ref[...], 0.0)
    # fc3 (no activation)
    h3 = jnp.dot(w3_ref[...], h2.astype(jnp.bfloat16),
                 preferred_element_type=jnp.float32)
    o_ref[...] = (h3 + b3_ref[...]).astype(o_ref.dtype)


def _round_up(n, m):
    return ((n + m - 1) // m) * m


_SINGLE_TILE_MAX = 512  # below this, one full-batch tile (latency path)


def prepare_params(params):
    """Cast weights to bf16 and reshape biases to [out, 1] ONCE (weights are
    constant in an RL loop; do not re-cast them every forward call)."""
    w1, b1, w2, b2, w3, b3 = params
    return (w1.astype(jnp.bfloat16), b1.reshape(-1, 1).astype(jnp.float32),
            w2.astype(jnp.bfloat16), b2.reshape(-1, 1).astype(jnp.float32),
            w3.astype(jnp.bfloat16), b3.reshape(-1, 1).astype(jnp.float32))


def network_forward(x, prepared_params, *, tm=2048):
    """x: [B, obs] f32 -> [B, action_space] f32."""
    w1, b1, w2, b2, w3, b3 = prepared_params
    B, obs = x.shape
    H1, H2, A = w1.shape[0], w2.shape[0], w3.shape[0]

    # Batch on the lane axis (feature-major). Wrapper transposes are cheap
    # layout plumbing at these sizes.
    x_t = x.T  # [obs, B]

    if B <= _SINGLE_TILE_MAX:
        TM = B  # single full-batch tile, no padding, no masking cost
    else:
        # >= 2 grid steps (lets v7x shard the batch over its 2 TensorCores);
        # lane-dim tile a multiple of 256 (full MXU width on v6e/v7x, 2x128
        # on v5e). VMEM is a non-issue at these sizes.
        TM = min(tm, _round_up((B + 1) // 2, 256))
    grid = (pl.cdiv(B, TM),)

    flops = 2 * B * (obs * H1 + H1 * H2 + H2 * A)
    bytes_accessed = (
        B * obs * 4                                   # x (f32)
        + (w1.size + w2.size + w3.size) * 2           # bf16 weights
        + (b1.size + b2.size + b3.size) * 4           # f32 biases
        + B * A * 4                                   # output (f32)
    )

    def resident(shape):
        # Constant index_map: DMA'd once, resident in VMEM across grid steps.
        return pl.BlockSpec(shape, lambda i: (0, 0))

    out_t = pl.pallas_call(
        mlp_kernel,
        out_shape=jax.ShapeDtypeStruct((A, B), jnp.float32),
        grid=grid,
        in_specs=[
            pl.BlockSpec((obs, TM), lambda i: (0, i)),  # x: streamed batch tile
            resident((H1, obs)), resident((H1, 1)),     # fc1 weight / bias
            resident((H2, H1)), resident((H2, 1)),      # fc2 weight / bias
            resident((A, H2)), resident((A, 1)),        # fc3 weight / bias
        ],
        out_specs=pl.BlockSpec((A, TM), lambda i: (0, i)),
        compiler_params=pltpu.CompilerParams(
            dimension_semantics=("parallel",)),
        cost_estimate=pl.CostEstimate(
            flops=flops, transcendentals=0, bytes_accessed=bytes_accessed),
    )(x_t, w1, b1, w2, b2, w3, b3)
    return out_t.T  # [B, A]


def init_linear(key, fan_in, fan_out):
    """PyTorch nn.Linear default init: U(-1/sqrt(fan_in), 1/sqrt(fan_in)).
    Weight kept in torch storage layout [fan_out, fan_in]."""
    kw, kb = jax.random.split(key)
    bound = 1.0 / math.sqrt(fan_in)
    w = jax.random.uniform(kw, (fan_out, fan_in), jnp.float32, -bound, bound)
    b = jax.random.uniform(kb, (fan_out,), jnp.float32, -bound, bound)
    return w, b


def reference_forward_f32(x, params):
    w1, b1, w2, b2, w3, b3 = params
    h = jnp.maximum(x @ w1.T + b1, 0.0)
    h = jnp.maximum(h @ w2.T + b2, 0.0)
    return h @ w3.T + b3


def reference_forward_bf16(x, params):
    """Precision-matched reference: bf16 dot operands, f32 accumulate."""
    w1, b1, w2, b2, w3, b3 = params
    bf = jnp.bfloat16
    h = jnp.dot(x.astype(bf), w1.T.astype(bf),
                preferred_element_type=jnp.float32) + b1
    h = jnp.maximum(h, 0.0)
    h = jnp.dot(h.astype(bf), w2.T.astype(bf),
                preferred_element_type=jnp.float32) + b2
    h = jnp.maximum(h, 0.0)
    return jnp.dot(h.astype(bf), w3.T.astype(bf),
                   preferred_element_type=jnp.float32) + b3


if __name__ == "__main__":
    # Shapes implied by the module:
    #   env.observation_space.shape = (obs_dim,), env.action_space.n = action_space
    batch = 2
    obs_dim = 8
    layer1_out = 32
    layer2_out = 32
    action_space = 4

    key = jax.random.PRNGKey(0)
    k_x, k_xl, k1, k2, k3 = jax.random.split(key, 5)

    x = jax.random.normal(k_x, (batch, obs_dim), jnp.float32)
    w1, b1 = init_linear(k1, obs_dim, layer1_out)
    w2, b2 = init_linear(k2, layer1_out, layer2_out)
    w3, b3 = init_linear(k3, layer2_out, action_space)
    params = (w1, b1, w2, b2, w3, b3)
    prepared = prepare_params(params)  # bf16 weights cached once

    # --- small-batch (RL inference) path: single full-batch tile ---
    out = jax.block_until_ready(network_forward(x, prepared))
    assert out.shape == (batch, action_space)
    ref_bf16 = reference_forward_bf16(x, params)
    ref_f32 = reference_forward_f32(x, params)
    assert jnp.allclose(out, ref_bf16, atol=5e-3, rtol=5e-3)
    assert jnp.allclose(out, ref_f32, atol=5e-2, rtol=5e-2)

    # --- larger batch: exercises the batch grid (2 tiles, ragged last tile) ---
    big_batch = 1000
    x_big = jax.random.normal(k_xl, (big_batch, obs_dim), jnp.float32)
    out_big = jax.block_until_ready(network_forward(x_big, prepared))
    assert out_big.shape == (big_batch, action_space)
    ref_big = reference_forward_bf16(x_big, params)
    assert jnp.allclose(out_big, ref_big, atol=5e-3, rtol=5e-3)
    assert bool(jnp.all(jnp.isfinite(out_big)))

    print("KERNEL_OK")
</pallas_src>

<mosaic_0001>
module attributes {stable_mosaic.version = 11 : i64} {
  func.func @mlp_kernel(%arg0: i32, %arg1: memref<8x2xf32, #tpu.memory_space<vmem>>, %arg2: memref<32x8xbf16, #tpu.memory_space<vmem>>, %arg3: memref<32x1xf32, #tpu.memory_space<vmem>>, %arg4: memref<32x32xbf16, #tpu.memory_space<vmem>>, %arg5: memref<32x1xf32, #tpu.memory_space<vmem>>, %arg6: memref<4x32xbf16, #tpu.memory_space<vmem>>, %arg7: memref<4x1xf32, #tpu.memory_space<vmem>>, %arg8: memref<4x2xf32, #tpu.memory_space<vmem>>) attributes {dimension_semantics = [#tpu.dimension_semantics<parallel>], iteration_bounds = array<i64: 1>, scalar_prefetch = 0 : i64, scratch_operands = 0 : i64, tpu.core_type = #tpu.core_type<tc>, window_params = [{transform_indices = @transform_0, window_bounds = array<i64: 8, 2>}, {pipeline_mode = #tpu.pipeline_mode<synchronous>, transform_indices = @transform_1, window_bounds = array<i64: 32, 8>}, {pipeline_mode = #tpu.pipeline_mode<synchronous>, transform_indices = @transform_2, window_bounds = array<i64: 32, 1>}, {pipeline_mode = #tpu.pipeline_mode<synchronous>, transform_indices = @transform_3, window_bounds = array<i64: 32, 32>}, {pipeline_mode = #tpu.pipeline_mode<synchronous>, transform_indices = @transform_4, window_bounds = array<i64: 32, 1>}, {pipeline_mode = #tpu.pipeline_mode<synchronous>, transform_indices = @transform_5, window_bounds = array<i64: 4, 32>}, {pipeline_mode = #tpu.pipeline_mode<synchronous>, transform_indices = @transform_6, window_bounds = array<i64: 4, 1>}, {transform_indices = @transform_7, window_bounds = array<i64: 4, 2>}]} {
    %c0 = arith.constant 0 : index
    %c0_0 = arith.constant 0 : index
    %0 = vector.load %arg1[%c0, %c0_0] : memref<8x2xf32, #tpu.memory_space<vmem>>, vector<8x2xf32>
    %1 = arith.truncf %0 : vector<8x2xf32> to vector<8x2xbf16>
    %c0_1 = arith.constant 0 : index
    %c0_2 = arith.constant 0 : index
    %2 = vector.load %arg2[%c0_1, %c0_2] : memref<32x8xbf16, #tpu.memory_space<vmem>>, vector<32x8xbf16>
    %cst = arith.constant dense<0.000000e+00> : vector<32x2xf32>
    %3 = tpu.matmul %2, %1, %cst {dimension_numbers = #tpu.dot_dimension_numbers<[1], [0], [0], [1], [0, 0, 1, 1], [], []>} : vector<32x8xbf16>, vector<8x2xbf16>, vector<32x2xf32> -> vector<32x2xf32>
    %c0_3 = arith.constant 0 : index
    %c0_4 = arith.constant 0 : index
    %4 = vector.load %arg3[%c0_3, %c0_4] : memref<32x1xf32, #tpu.memory_space<vmem>>, vector<32x1xf32>
    %5 = vector.broadcast %4 : vector<32x1xf32> to vector<32x2xf32>
    %6 = arith.addf %3, %5 : vector<32x2xf32>
    %cst_5 = arith.constant 0.000000e+00 : f32
    %7 = vector.broadcast %cst_5 : f32 to vector<32x2xf32>
    %8 = arith.maximumf %6, %7 : vector<32x2xf32>
    %c0_6 = arith.constant 0 : index
    %c0_7 = arith.constant 0 : index
    %9 = vector.load %arg4[%c0_6, %c0_7] : memref<32x32xbf16, #tpu.memory_space<vmem>>, vector<32x32xbf16>
    %10 = arith.truncf %8 : vector<32x2xf32> to vector<32x2xbf16>
    %cst_8 = arith.constant dense<0.000000e+00> : vector<32x2xf32>
    %11 = tpu.matmul %9, %10, %cst_8 {dimension_numbers = #tpu.dot_dimension_numbers<[1], [0], [0], [1], [0, 0, 1, 1], [], []>} : vector<32x32xbf16>, vector<32x2xbf16>, vector<32x2xf32> -> vector<32x2xf32>
    %c0_9 = arith.constant 0 : index
    %c0_10 = arith.constant 0 : index
    %12 = vector.load %arg5[%c0_9, %c0_10] : memref<32x1xf32, #tpu.memory_space<vmem>>, vector<32x1xf32>
    %13 = vector.broadcast %12 : vector<32x1xf32> to vector<32x2xf32>
    %14 = arith.addf %11, %13 : vector<32x2xf32>
    %cst_11 = arith.constant 0.000000e+00 : f32
    %15 = vector.broadcast %cst_11 : f32 to vector<32x2xf32>
    %16 = arith.maximumf %14, %15 : vector<32x2xf32>
    %c0_12 = arith.constant 0 : index
    %c0_13 = arith.constant 0 : index
    %17 = vector.load %arg6[%c0_12, %c0_13] : memref<4x32xbf16, #tpu.memory_space<vmem>>, vector<4x32xbf16>
    %18 = arith.truncf %16 : vector<32x2xf32> to vector<32x2xbf16>
    %cst_14 = arith.constant dense<0.000000e+00> : vector<4x2xf32>
    %19 = tpu.matmul %17, %18, %cst_14 {dimension_numbers = #tpu.dot_dimension_numbers<[1], [0], [0], [1], [0, 0, 1, 1], [], []>} : vector<4x32xbf16>, vector<32x2xbf16>, vector<4x2xf32> -> vector<4x2xf32>
    %c0_15 = arith.constant 0 : index
    %c0_16 = arith.constant 0 : index
    %20 = vector.load %arg7[%c0_15, %c0_16] : memref<4x1xf32, #tpu.memory_space<vmem>>, vector<4x1xf32>
    %21 = vector.broadcast %20 : vector<4x1xf32> to vector<4x2xf32>
    %22 = arith.addf %19, %21 : vector<4x2xf32>
    %c0_17 = arith.constant 0 : index
    %c0_18 = arith.constant 0 : index
    %23 = vector.load %arg8[%c0_17, %c0_18] : memref<4x2xf32, #tpu.memory_space<vmem>>, vector<4x2xf32>
    tpu.vector_store %arg8[%c0_17, %c0_18], %22 {strides = array<i32>} : memref<4x2xf32, #tpu.memory_space<vmem>>, vector<4x2xf32>,
    return
  }
  func.func @transform_0(%arg0: i32) -> (i32, i32) {
    %c0_i32 = arith.constant 0 : i32
    %c0_i32_0 = arith.constant 0 : i32
    return %c0_i32, %arg0 : i32, i32
  }
  func.func @transform_1(%arg0: i32) -> (i32, i32) {
    %c0_i32 = arith.constant 0 : i32
    %c0_i32_0 = arith.constant 0 : i32
    %c0_i32_1 = arith.constant 0 : i32
    return %c0_i32, %c0_i32_0 : i32, i32
  }
  func.func @transform_2(%arg0: i32) -> (i32, i32) {
    %c0_i32 = arith.constant 0 : i32
    %c0_i32_0 = arith.constant 0 : i32
    %c0_i32_1 = arith.constant 0 : i32
    return %c0_i32, %c0_i32_0 : i32, i32
  }
  func.func @transform_3(%arg0: i32) -> (i32, i32) {
    %c0_i32 = arith.constant 0 : i32
    %c0_i32_0 = arith.constant 0 : i32
    %c0_i32_1 = arith.constant 0 : i32
    return %c0_i32, %c0_i32_0 : i32, i32
  }
  func.func @transform_4(%arg0: i32) -> (i32, i32) {
    %c0_i32 = arith.constant 0 : i32
    %c0_i32_0 = arith.constant 0 : i32
    %c0_i32_1 = arith.constant 0 : i32
    return %c0_i32, %c0_i32_0 : i32, i32
  }
  func.func @transform_5(%arg0: i32) -> (i32, i32) {
    %c0_i32 = arith.constant 0 : i32
    %c0_i32_0 = arith.constant 0 : i32
    %c0_i32_1 = arith.constant 0 : i32
    return %c0_i32, %c0_i32_0 : i32, i32
  }
  func.func @transform_6(%arg0: i32) -> (i32, i32) {
    %c0_i32 = arith.constant 0 : i32
    %c0_i32_0 = arith.constant 0 : i32
    %c0_i32_1 = arith.constant 0 : i32
    return %c0_i32, %c0_i32_0 : i32, i32
  }
  func.func @transform_7(%arg0: i32) -> (i32, i32) {
    %c0_i32 = arith.constant 0 : i32
    %c0_i32_0 = arith.constant 0 : i32
    return %c0_i32, %arg0 : i32, i32
  }
}

</mosaic_0001>

<bundles_post_ra>
// kernel: tpu_custom_call.1
= control target key start
LH: loop header
LB: loop body
LE: loop exit
PB: predicated region body
PF: predicated region fallthrough
CT: control target
= control target key end

     0   :  { %vm74_vm0 = vcmask 1043456   ;;  %vm67_vm1 = vcmask 64512   ;;  %v340_v1 = vmov 0   ;;  %vm171_vm2 = vcmask 261120   ;;  %s436_s0 = inlined_call_operand.vmem [shape: f32[8,2], index: 0, kind: input, shape index: {}]   ;;  %s437_s1 = inlined_call_operand.vmem [shape: bf16[32,8], index: 1, kind: input, shape index: {}]   ;;  %s438_s2 = inlined_call_operand.vmem [shape: f32[32,1], index: 2, kind: input, shape index: {}]   ;;  %s439_s4 = inlined_call_operand.vmem [shape: f32[32,1], index: 4, kind: input, shape index: {}]   ;;  %s440_s6 = inlined_call_operand.vmem [shape: f32[4,1], index: 6, kind: input, shape index: {}]   ;;  %s441_s3 = inlined_call_operand.vmem [shape: bf16[32,32], index: 3, kind: input, shape index: {}]   ;;  %s442_s5 = inlined_call_operand.vmem [shape: bf16[4,32], index: 5, kind: input, shape index: {}]   ;;  %s443_s7 = inlined_call_operand.vmem [shape: f32[4,2], index: 7, kind: output, shape index: {}]  }
   0x1   :  { %v27_v0 = vld [vmem:[%s436_s0] sm:$0xff]  ;;  %334 = vset.pattern.permute.xlu0 %v340_v1  ;;  %335 = vset.pattern.permute.xlu1 %v340_v1  ;;  %v35_v4 = vld [vmem:[%s438_s2 + $0x10] sm:$0xff]  ;;  %v337_v6 = vld [vmem:[%s437_s1 + $0x8] sm:$0xff]   ;;  %v341_v35 = vmov 0.0   ;;  %vm342_vm3 = vmmov 0   ;;  %vm283_vm4 = vcmask 11264  }
   0x2   :  { %v28_v2 = vpack.c.bf16 %v27_v0, %v27_v0  ;;  %v336_v3 = vld [vmem:[%s437_s1] sm:$0xff]   ;;  %49 = vperm.xlu0 %334, %v35_v4   ;;  %v36_v8 = vld [vmem:[%s438_s2 + $0x18] sm:$0xff]  ;;  %v34_v9 = vld [vmem:[%s438_s2 + $0x8] sm:$0xff] }
   0x3   :  { %310 = vmatprep.mubr.msk.bf16.mxu0 %vm67_vm1, %v336_v3  ;;  %v33_v7 = vld [vmem:[%s438_s2] sm:$0xff]  ;;  %v139_v10 = vld [vmem:[%s439_s4 + $0x10] sm:$0xff]  ;;  %v140_v11 = vld [vmem:[%s439_s4 + $0x18] sm:$0xff] }
   0x4   :  { %330 = vmatprep.subr.msk.bf16.mxu0 %vm74_vm0, %v28_v2  ;;  %v76_v5 = vsel %vm74_vm0, %v28_v2, 0  ;;  %39 = vperm.xlu1 %335, %v33_v7   ;;  %v137_v12 = vld [vmem:[%s439_s4] sm:$0xff]  ;;  %v138_v13 = vld [vmem:[%s439_s4 + $0x8] sm:$0xff] }
   0x5   :  { %309 = vmatpush3.bf16.msra.mxu0 %v76_v5  ;;  %v234_v14 = vld [vmem:[%s440_s6] sm:$0xf]  ;;  %v339_v34 = vld [vmem:[%s441_s3 + $0x8] sm:$0xff]  }
   0x6   :  { %54 = vperm.xlu0 %334, %v36_v8   ;;  %v338_v15 = vld [vmem:[%s441_s3] sm:$0xff]   ;;  %322 = vmatprep.subr.bf16.mxu0 %v341_v35 }
   0x7   :  { %318 = vmatprep.mubr.msk.bf16.mxu1 %vm171_vm2, %v338_v15  ;;  %v231_v54 = vld [vmem:[%s442_s5] sm:$0x3] }
   0x8   :  { %311 = vmatmul.mubr.msk.bf16.vlgmr.msra.gmra.mxu0 %vm67_vm1, %v337_v6  ;;  %44 = vperm.xlu1 %335, %v34_v9  }
   0x9   :  { %326 = vmatprep.mubr.msk.bf16.mxu0 %vm342_vm3, %v341_v35 }
   0xa   :  { %153 = vperm.xlu0 %334, %v139_v10  }
   0xc   :  { %158 = vperm.xlu1 %335, %v140_v11  }
   0xe   :  { %143 = vperm.xlu0 %334, %v137_v12  }
  0x10   :  { %148 = vperm.xlu1 %335, %v138_v13  }
  0x12   :  { %237 = vperm.xlu0 %334, %v234_v14  }
  0x7d   :  { %v50_v16 = vpop.permute.xlu0 %49 }
  0x7f   :  { %v40_v17 = vpop.permute.xlu1 %39 }
  0x81   :  { %v55_v21 = vpop.permute.xlu0 %54 }
  0x83   :  { %v45_v25 = vpop.permute.xlu1 %44 }
  0x85   :  { %v154_v36 = vpop.permute.xlu0 %153 }
  0x87   :  { %v159_v37 = vpop.permute.xlu1 %158 }
  0x89   :  { %v144_v42 = vpop.permute.xlu0 %143 }
  0x8b   :  { %v149_v44 = vpop.permute.xlu1 %148 }
  0x8d   :  { %v238_v55 = vpop.permute.xlu0 %237 }
  0xc8   :  { %v312_v18 = vpop.f32.mrf.mxu0 }
  0xc9   :  { %v121_v20 = vadd.f32 %v312_v18, %v50_v16 }
  0xca   :  { %v112_v19 = vpop.f32.mrf.mxu0 }
  0xcb   :  { %v113_v23 = vadd.f32 %v112_v19, %v40_v17  ;;  %v129_v27 = vmax.f32 %v121_v20, 0.0 }
  0xcc   :  { %v313_v22 = vpop.f32.mrf.mxu0 }
  0xcd   :  { %v124_v24 = vadd.f32 %v313_v22, %v55_v21  ;;  %v127_v30 = vmax.f32 %v113_v23, 0.0 }
  0xce   :  { %v115_v26 = vpop.f32.mrf.mxu0 }
  0xcf   :  { %v130_v28 = vmax.f32 %v124_v24, 0.0  ;;  %v116_v29 = vadd.f32 %v115_v26, %v45_v25 }
  0xd1   :  { %v128_v31 = vmax.f32 %v116_v29, 0.0  ;;  %v136_v32 = vpack.c.bf16 %v130_v28, %v129_v27 }
  0xd3   :  { %v135_v33 = vpack.c.bf16 %v128_v31, %v127_v30  ;;  %314 = vmatprep.subr.bf16.mxu1 %v136_v32 }
  0xd4   :  { %315 = vmatpush3.bf16.msra.mxu1 %v136_v32 }
  0xd5   :  { %316 = vmatprep.subr.bf16.mxu1 %v135_v33 }
  0xd8   :  { %317 = vmatpush3.bf16.msra.mxu1 %v135_v33 }
  0xdb   :  { %319 = vmatmul.mubr.msk.bf16.vlgmr.msra.gmra.mxu1 %vm171_vm2, %v339_v34 }
 0x19b   :  { %v320_v38 = vpop.f32.mrf.mxu1 }
 0x19c   :  { %v221_v40 = vadd.f32 %v320_v38, %v154_v36 }
 0x19d   :  { %v212_v39 = vpop.f32.mrf.mxu1 }
 0x19e   :  { %v229_v46 = vmax.f32 %v221_v40, 0.0  ;;  %v213_v47 = vadd.f32 %v212_v39, %v144_v42 }
 0x19f   :  { %v321_v41 = vpop.f32.mrf.mxu1 }
 0x1a0   :  { %v224_v43 = vadd.f32 %v321_v41, %v159_v37  ;;  %v227_v52 = vmax.f32 %v213_v47, 0.0 }
 0x1a1   :  { %v215_v45 = vpop.f32.mrf.mxu1 }
 0x1a2   :  { %v230_v48 = vmax.f32 %v224_v43, 0.0  ;;  %v216_v49 = vadd.f32 %v215_v45, %v149_v44 }
 0x1a4   :  { %v233_v50 = vpack.c.bf16 %v230_v48, %v229_v46  ;;  %v228_v51 = vmax.f32 %v216_v49, 0.0 }
 0x1a6   :  { %323 = vmatpush3.bf16.msra.mxu0 %v233_v50  ;;  %v232_v53 = vpack.c.bf16 %v228_v51, %v227_v52 }
 0x1a7   :  { %324 = vmatprep.subr.bf16.mxu0 %v341_v35 }
 0x1aa   :  { %325 = vmatpush3.bf16.msra.mxu0 %v232_v53 }
 0x1ad   :  { %327 = vmatmul.mubr.msk.bf16.vlgmr.msra.gmra.mxu0 %vm171_vm2, %v231_v54 }
 0x26d   :  { %v277_v56 = vpop.f32.mrf.mxu0 }
 0x26e   :  { %v278_v57 = vadd.f32 %v277_v56, %v238_v55 }
 0x26f   :  { %v328_v58 = vpop.f32.mrf.mxu0 }
 0x270   :  { %284 = vst.msk [vmem:[%s443_s7] sm:$0xf] %vm283_vm4, %v278_v57 }
 0x271   :  { %v280_v59 = vpop.f32.mrf.mxu0 }
 0x273   :  { %v329_v60 = vpop.f32.mrf.mxu0 }

</bundles_post_ra>
